<compile_context>
chip_gen: v5e
topology: v5e:2x2
jax: 0.10.0
libtpu: 0.0.40
codegen_flags: <defaults>
</compile_context>

<pallas_src>
import functools

import jax
import jax.numpy as jnp
from jax.experimental import pallas as pl
from jax.experimental.pallas import tpu as pltpu

_LN_EPS = 1e-5
_INV_SQRT2 = 0.7071067811865476
_TANH_C0 = 0.7978845608028654    # sqrt(2/pi)
_TANH_C1 = 0.044715


def _gelu(x, approximate=False):
    if approximate:
        # tanh-approx GELU: transcendental goes to the EUP slot (idle under MXU).
        return 0.5 * x * (1.0 + jnp.tanh(_TANH_C0 * (x + _TANH_C1 * x * x * x)))
    # PyTorch nn.GELU() default = exact erf formulation.
    return 0.5 * x * (1.0 + jax.lax.erf(x * _INV_SQRT2))


def _layernorm(x, gamma, beta):
    # One-pass variance (E[x^2] - mu^2): the two cross-lane reductions are
    # independent, so the XLU work isn't serialized on mu.
    mu = jnp.mean(x, axis=-1, keepdims=True)
    ms = jnp.mean(x * x, axis=-1, keepdims=True)
    var = jnp.maximum(ms - mu * mu, 0.0)
    return (x - mu) * jax.lax.rsqrt(var + _LN_EPS) * gamma + beta


def mixer_kernel(x_ref,
                 g1_ref, be1_ref, g2_ref, be2_ref,
                 wt1_ref, bt1_ref, wt2_ref, bt2_ref,
                 wc1_ref, bc1_ref, wc2_ref, bc2_ref,
                 o_ref, xmid_ref,
                 *, block_b, d_token, d_channel, gelu_approx):
    T, C = d_token, d_channel
    mm = wt1_ref.dtype                           # bf16 (default) or f32

    # ---- token-mixing branch (transpose-free) ------------------------------
    # PyTorch: z = token_mlp(norm1(x).transpose(1,2)).transpose(1,2)
    # Algebra: z[b] = Wt2 @ gelu(Wt1 @ norm1(x[b]) + bt1[:,None]) + bt2[:,None]
    # with Wt1/Wt2 stored in (out, in) layout -> activations stay in (T, C).
    for b in range(block_b):                     # static unroll; block_b small
        xb = x_ref[b * T:(b + 1) * T, :].astype(jnp.float32)     # (T, C)
        xn = _layernorm(xb, g1_ref[...], be1_ref[...])
        h = jnp.dot(wt1_ref[...], xn.astype(mm),
                    preferred_element_type=jnp.float32) + bt1_ref[...]
        h = _gelu(h, gelu_approx)
        z = jnp.dot(wt2_ref[...], h.astype(mm),
                    preferred_element_type=jnp.float32) + bt2_ref[...]
        xmid_ref[b * T:(b + 1) * T, :] = xb + z   # token-mixed x, f32 scratch

    # ---- channel-mixing branch: big-M matmuls on the whole flat slab -------
    xm = xmid_ref[...]                            # (block_b*T, C) f32
    xn = _layernorm(xm, g2_ref[...], be2_ref[...])
    h = jnp.dot(xn.astype(mm), wc1_ref[...],
                preferred_element_type=jnp.float32) + bc1_ref[...]
    h = _gelu(h, gelu_approx)
    y = jnp.dot(h.astype(mm), wc2_ref[...],
                preferred_element_type=jnp.float32) + bc2_ref[...]
    o_ref[...] = (xm + y).astype(o_ref.dtype)


@functools.partial(jax.jit, static_argnames=("block_b", "compute_dtype",
                                             "io_dtype", "gelu_approx"))
def mixer_layer(x, params, block_b=None, compute_dtype=jnp.bfloat16,
                io_dtype=jnp.bfloat16, gelu_approx=False):
    B, T, C = x.shape
    assert T % 8 == 0, "pad d_token to a multiple of 8 (ideally 256 on v6e/v7x)"
    (g1, be1, g2, be2,
     wt1, bt1, wt2, bt2,
     wc1, bc1, wc2, bc2) = params

    if block_b is None:
        # VMEM-budget block size: keep the per-step slab around <= 1024 rows
        # (~2 MB f32 at C=512), keep the token-branch unroll small, and keep
        # >= 8 grid steps (>= 4 per v7x TensorCore) whenever B allows it so
        # BlockSpec double-buffering overlaps HBM DMA with compute.
        max_rows, max_unroll, min_steps = 1024, 16, 8
        divisors = [d for d in range(1, B + 1) if B % d == 0]
        cand = [d for d in divisors if d * T <= max_rows and d <= max_unroll] or [1]
        block_b = max(cand)
        while B // block_b < min_steps:
            smaller = [d for d in cand if d < block_b]
            if not smaller:
                break
            block_b = max(smaller)
    assert B % block_b == 0, "block_b must divide B"
    grid = (B // block_b,)
    rows = block_b * T

    # Activations live in HBM as io_dtype (bf16 halves HBM traffic -> big win
    # on v6e where this kernel is HBM-bound); internal math is f32 in VMEM.
    x2 = x.reshape(B * T, C).astype(io_dtype)     # free reshape outside kernel

    # Token weights in (out, in) layout so the kernel left-multiplies and the
    # activations never need the (T,C)->(C,T) relayout.  Channel weights stay
    # (in, out).  MXU operands in compute_dtype; biases/LN params stay f32.
    wt1_l = wt1.T.astype(compute_dtype)
    wt2_l = wt2.T.astype(compute_dtype)
    wc1_c = wc1.astype(compute_dtype)
    wc2_c = wc2.astype(compute_dtype)
    bt1_c = bt1.reshape(T, 1)                     # column bias (per out-token)
    bt2_c = bt2.reshape(T, 1)

    def full(shape):
        # Grid-invariant block: same block index every step -> DMA'd once.
        # (pipeline_mode=pl.Buffered(1) would also single-buffer it in VMEM.)
        return pl.BlockSpec(shape, lambda b: (0, 0))

    io_bytes = jnp.dtype(io_dtype).itemsize
    w_bytes = (2 * T * T + 2 * C * C) * jnp.dtype(compute_dtype).itemsize
    cost = pl.CostEstimate(
        flops=int(4 * B * T * C * (T + C)),               # 4 matmuls
        transcendentals=int(2 * B * T * C),               # GELU in both MLPs
        bytes_accessed=int(2 * B * T * C * io_bytes + w_bytes
                           + (2 * T + 6 * C) * 4))

    kernel = functools.partial(mixer_kernel, block_b=block_b, d_token=T,
                               d_channel=C, gelu_approx=gelu_approx)

    out2 = pl.pallas_call(
        kernel,
        out_shape=jax.ShapeDtypeStruct((B * T, C), io_dtype),
        grid_spec=pltpu.PrefetchScalarGridSpec(
            num_scalar_prefetch=0,
            grid=grid,
            in_specs=[
                pl.BlockSpec((rows, C), lambda b: (b, 0)),   # x slab
                full((1, C)), full((1, C)),                  # norm1 gamma/beta
                full((1, C)), full((1, C)),                  # norm2 gamma/beta
                full((T, T)), full((T, 1)),                  # token fc1 W(out,in), b
                full((T, T)), full((T, 1)),                  # token fc2 W(out,in), b
                full((C, C)), full((1, C)),                  # channel fc1 W(in,out), b
                full((C, C)), full((1, C)),                  # channel fc2 W(in,out), b
            ],
            out_specs=pl.BlockSpec((rows, C), lambda b: (b, 0)),
            scratch_shapes=[pltpu.VMEM((rows, C), jnp.float32)],
        ),
        compiler_params=pltpu.CompilerParams(
            dimension_semantics=("parallel",),
            vmem_limit_bytes=32 * 1024 * 1024),
        cost_estimate=cost,
    )(x2, g1, be1, g2, be2, wt1_l, bt1_c, wt2_l, bt2_c, wc1_c, bc1, wc2_c, bc2)

    return out2.reshape(B, T, C)


def mixer_ref(x, params):
    """Pure-JAX reference mirroring MixerLayer.forward."""
    (g1, be1, g2, be2,
     wt1, bt1, wt2, bt2,
     wc1, bc1, wc2, bc2) = params
    res = x
    h = _layernorm(x, g1[0], be1[0])
    z = jnp.swapaxes(h, 1, 2)                            # (B, C, T)
    z = _gelu(z @ wt1 + bt1[0]) @ wt2 + bt2[0]
    x = jnp.swapaxes(z, 1, 2) + res
    res = x
    h = _layernorm(x, g2[0], be2[0])
    y = _gelu(h @ wc1 + bc1[0]) @ wc2 + bc2[0]
    return y + res


def init_params(key, T, C):
    # Linear weights stored as (in, out); the wrapper derives the (out, in)
    # form needed for the transpose-free token branch.
    # NOTE: the PyTorch module zero-inits the *last* linear of each MLP
    # (making the block an identity at init); here we use small random values
    # instead so the matmul/GELU hot path is actually exercised.
    ks = jax.random.split(key, 8)
    st = 1.0 / float(T) ** 0.5
    sc = 1.0 / float(C) ** 0.5
    g1 = jnp.ones((1, C), jnp.float32)
    be1 = jnp.zeros((1, C), jnp.float32)
    g2 = jnp.ones((1, C), jnp.float32)
    be2 = jnp.zeros((1, C), jnp.float32)
    wt1 = jax.random.normal(ks[0], (T, T), jnp.float32) * st
    bt1 = jax.random.normal(ks[1], (1, T), jnp.float32) * 0.1
    wt2 = jax.random.normal(ks[2], (T, T), jnp.float32) * st
    bt2 = jax.random.normal(ks[3], (1, T), jnp.float32) * 0.1
    wc1 = jax.random.normal(ks[4], (C, C), jnp.float32) * sc
    bc1 = jax.random.normal(ks[5], (1, C), jnp.float32) * 0.1
    wc2 = jax.random.normal(ks[6], (C, C), jnp.float32) * sc
    bc2 = jax.random.normal(ks[7], (1, C), jnp.float32) * 0.1
    return (g1, be1, g2, be2, wt1, bt1, wt2, bt2, wc1, bc1, wc2, bc2)


if __name__ == "__main__":
    B, T, C = 8, 16, 32          # batch, d_token (seq), d_channel
    key = jax.random.PRNGKey(0)
    kx, kp = jax.random.split(key)
    x = jax.random.normal(kx, (B, T, C), jnp.float32)
    params = init_params(kp, T, C)

    ref = mixer_ref(x, params)

    # Exact path: f32 activations in HBM + f32 MXU operands.
    out_f32 = mixer_layer(x, params, compute_dtype=jnp.float32,
                          io_dtype=jnp.float32)
    jax.block_until_ready(out_f32)
    assert out_f32.shape == (B, T, C)
    assert jnp.allclose(out_f32, ref, atol=1e-4, rtol=1e-4), \
        "f32 mismatch vs reference"

    # Fast path (default): bf16 HBM activations + bf16 MXU operands,
    # f32 accumulate / LayerNorm / GELU / residual inside the kernel.
    out_fast = mixer_layer(x, params)
    jax.block_until_ready(out_fast)
    assert out_fast.shape == (B, T, C)
    max_err = float(jnp.max(jnp.abs(out_fast.astype(jnp.float32) - ref)))
    assert max_err < 0.3, f"bf16 path too far from f32 reference: {max_err}"

    print("KERNEL_OK")
</pallas_src>

<mosaic_0001>
module attributes {stable_mosaic.version = 11 : i64} {
  func.func @mixer_kernel(%arg0: i32, %arg1: memref<16x32xf32, #tpu.memory_space<vmem>>, %arg2: memref<1x32xf32, #tpu.memory_space<vmem>>, %arg3: memref<1x32xf32, #tpu.memory_space<vmem>>, %arg4: memref<1x32xf32, #tpu.memory_space<vmem>>, %arg5: memref<1x32xf32, #tpu.memory_space<vmem>>, %arg6: memref<16x16xf32, #tpu.memory_space<vmem>>, %arg7: memref<16x1xf32, #tpu.memory_space<vmem>>, %arg8: memref<16x16xf32, #tpu.memory_space<vmem>>, %arg9: memref<16x1xf32, #tpu.memory_space<vmem>>, %arg10: memref<32x32xf32, #tpu.memory_space<vmem>>, %arg11: memref<1x32xf32, #tpu.memory_space<vmem>>, %arg12: memref<32x32xf32, #tpu.memory_space<vmem>>, %arg13: memref<1x32xf32, #tpu.memory_space<vmem>>, %arg14: memref<16x32xf32, #tpu.memory_space<vmem>>, %arg15: memref<16x32xf32, #tpu.memory_space<vmem>>) attributes {dimension_semantics = [#tpu.dimension_semantics<parallel>], iteration_bounds = array<i64: 8>, scalar_prefetch = 0 : i64, scratch_operands = 1 : i64, tpu.core_type = #tpu.core_type<tc>, window_params = [{transform_indices = @transform_0, window_bounds = array<i64: 16, 32>}, {pipeline_mode = #tpu.pipeline_mode<synchronous>, transform_indices = @transform_1, window_bounds = array<i64: 1, 32>}, {pipeline_mode = #tpu.pipeline_mode<synchronous>, transform_indices = @transform_2, window_bounds = array<i64: 1, 32>}, {pipeline_mode = #tpu.pipeline_mode<synchronous>, transform_indices = @transform_3, window_bounds = array<i64: 1, 32>}, {pipeline_mode = #tpu.pipeline_mode<synchronous>, transform_indices = @transform_4, window_bounds = array<i64: 1, 32>}, {pipeline_mode = #tpu.pipeline_mode<synchronous>, transform_indices = @transform_5, window_bounds = array<i64: 16, 16>}, {pipeline_mode = #tpu.pipeline_mode<synchronous>, transform_indices = @transform_6, window_bounds = array<i64: 16, 1>}, {pipeline_mode = #tpu.pipeline_mode<synchronous>, transform_indices = @transform_7, window_bounds = array<i64: 16, 16>}, {pipeline_mode = #tpu.pipeline_mode<synchronous>, transform_indices = @transform_8, window_bounds = array<i64: 16, 1>}, {pipeline_mode = #tpu.pipeline_mode<synchronous>, transform_indices = @transform_9, window_bounds = array<i64: 32, 32>}, {pipeline_mode = #tpu.pipeline_mode<synchronous>, transform_indices = @transform_10, window_bounds = array<i64: 1, 32>}, {pipeline_mode = #tpu.pipeline_mode<synchronous>, transform_indices = @transform_11, window_bounds = array<i64: 32, 32>}, {pipeline_mode = #tpu.pipeline_mode<synchronous>, transform_indices = @transform_12, window_bounds = array<i64: 1, 32>}, {transform_indices = @transform_13, window_bounds = array<i64: 16, 32>}]} {
    %c0 = arith.constant 0 : index
    %c0_0 = arith.constant 0 : index
    %0 = vector.load %arg1[%c0, %c0_0] : memref<16x32xf32, #tpu.memory_space<vmem>>, vector<16x32xf32>
    %c0_1 = arith.constant 0 : index
    %c0_2 = arith.constant 0 : index
    %1 = vector.load %arg2[%c0_1, %c0_2] : memref<1x32xf32, #tpu.memory_space<vmem>>, vector<1x32xf32>
    %c0_3 = arith.constant 0 : index
    %c0_4 = arith.constant 0 : index
    %2 = vector.load %arg3[%c0_3, %c0_4] : memref<1x32xf32, #tpu.memory_space<vmem>>, vector<1x32xf32>
    %cst = arith.constant dense<0.000000e+00> : vector<16xf32>
    %3 = vector.multi_reduction <add>, %0, %cst [1] : vector<16x32xf32> to vector<16xf32>
    %4 = vector.shape_cast %3 : vector<16xf32> to vector<16x1xf32>
    %cst_5 = arith.constant 3.200000e+01 : f32
    %5 = vector.broadcast %cst_5 : f32 to vector<16x1xf32>
    %6 = arith.divf %4, %5 : vector<16x1xf32>
    %7 = arith.mulf %0, %0 : vector<16x32xf32>
    %cst_6 = arith.constant dense<0.000000e+00> : vector<16xf32>
    %8 = vector.multi_reduction <add>, %7, %cst_6 [1] : vector<16x32xf32> to vector<16xf32>
    %9 = vector.shape_cast %8 : vector<16xf32> to vector<16x1xf32>
    %cst_7 = arith.constant 3.200000e+01 : f32
    %10 = vector.broadcast %cst_7 : f32 to vector<16x1xf32>
    %11 = arith.divf %9, %10 : vector<16x1xf32>
    %12 = arith.mulf %6, %6 : vector<16x1xf32>
    %13 = arith.subf %11, %12 : vector<16x1xf32>
    %cst_8 = arith.constant 0.000000e+00 : f32
    %14 = vector.broadcast %cst_8 : f32 to vector<16x1xf32>
    %15 = arith.maximumf %13, %14 : vector<16x1xf32>
    %16 = vector.broadcast %6 : vector<16x1xf32> to vector<16x32xf32>
    %17 = arith.subf %0, %16 : vector<16x32xf32>
    %cst_9 = arith.constant 9.99999974E-6 : f32
    %18 = vector.broadcast %cst_9 : f32 to vector<16x1xf32>
    %19 = arith.addf %15, %18 : vector<16x1xf32>
    %20 = math.rsqrt %19 : vector<16x1xf32>
    %21 = vector.broadcast %20 : vector<16x1xf32> to vector<16x32xf32>
    %22 = arith.mulf %17, %21 : vector<16x32xf32>
    %23 = vector.broadcast %1 : vector<1x32xf32> to vector<16x32xf32>
    %24 = arith.mulf %22, %23 : vector<16x32xf32>
    %25 = vector.broadcast %2 : vector<1x32xf32> to vector<16x32xf32>
    %26 = arith.addf %24, %25 : vector<16x32xf32>
    %c0_10 = arith.constant 0 : index
    %c0_11 = arith.constant 0 : index
    %27 = vector.load %arg6[%c0_10, %c0_11] : memref<16x16xf32, #tpu.memory_space<vmem>>, vector<16x16xf32>
    %cst_12 = arith.constant dense<0.000000e+00> : vector<16x32xf32>
    %28 = tpu.matmul %27, %26, %cst_12 {dimension_numbers = #tpu.dot_dimension_numbers<[1], [0], [0], [1], [0, 0, 1, 1], [], []>} : vector<16x16xf32>, vector<16x32xf32>, vector<16x32xf32> -> vector<16x32xf32>
    %c0_13 = arith.constant 0 : index
    %c0_14 = arith.constant 0 : index
    %29 = vector.load %arg7[%c0_13, %c0_14] : memref<16x1xf32, #tpu.memory_space<vmem>>, vector<16x1xf32>
    %30 = vector.broadcast %29 : vector<16x1xf32> to vector<16x32xf32>
    %31 = arith.addf %28, %30 : vector<16x32xf32>
    %cst_15 = arith.constant 5.000000e-01 : f32
    %32 = vector.broadcast %cst_15 : f32 to vector<16x32xf32>
    %33 = arith.mulf %32, %31 : vector<16x32xf32>
    %cst_16 = arith.constant 0.707106769 : f32
    %34 = vector.broadcast %cst_16 : f32 to vector<16x32xf32>
    %35 = arith.mulf %31, %34 : vector<16x32xf32>
    %36 = math.erf %35 : vector<16x32xf32>
    %cst_17 = arith.constant 1.000000e+00 : f32
    %37 = vector.broadcast %cst_17 : f32 to vector<16x32xf32>
    %38 = arith.addf %37, %36 : vector<16x32xf32>
    %39 = arith.mulf %33, %38 : vector<16x32xf32>
    %c0_18 = arith.constant 0 : index
    %c0_19 = arith.constant 0 : index
    %40 = vector.load %arg8[%c0_18, %c0_19] : memref<16x16xf32, #tpu.memory_space<vmem>>, vector<16x16xf32>
    %cst_20 = arith.constant dense<0.000000e+00> : vector<16x32xf32>
    %41 = tpu.matmul %40, %39, %cst_20 {dimension_numbers = #tpu.dot_dimension_numbers<[1], [0], [0], [1], [0, 0, 1, 1], [], []>} : vector<16x16xf32>, vector<16x32xf32>, vector<16x32xf32> -> vector<16x32xf32>
    %c0_21 = arith.constant 0 : index
    %c0_22 = arith.constant 0 : index
    %42 = vector.load %arg9[%c0_21, %c0_22] : memref<16x1xf32, #tpu.memory_space<vmem>>, vector<16x1xf32>
    %43 = vector.broadcast %42 : vector<16x1xf32> to vector<16x32xf32>
    %44 = arith.addf %41, %43 : vector<16x32xf32>
    %45 = arith.addf %0, %44 : vector<16x32xf32>
    %c0_23 = arith.constant 0 : index
    %c0_24 = arith.constant 0 : index
    %46 = vector.load %arg15[%c0_23, %c0_24] : memref<16x32xf32, #tpu.memory_space<vmem>>, vector<16x32xf32>
    tpu.vector_store %arg15[%c0_23, %c0_24], %45 {strides = array<i32>} : memref<16x32xf32, #tpu.memory_space<vmem>>, vector<16x32xf32>,
    %c0_25 = arith.constant 0 : index
    %c0_26 = arith.constant 0 : index
    %47 = vector.load %arg15[%c0_25, %c0_26] : memref<16x32xf32, #tpu.memory_space<vmem>>, vector<16x32xf32>
    %c0_27 = arith.constant 0 : index
    %c0_28 = arith.constant 0 : index
    %48 = vector.load %arg4[%c0_27, %c0_28] : memref<1x32xf32, #tpu.memory_space<vmem>>, vector<1x32xf32>
    %c0_29 = arith.constant 0 : index
    %c0_30 = arith.constant 0 : index
    %49 = vector.load %arg5[%c0_29, %c0_30] : memref<1x32xf32, #tpu.memory_space<vmem>>, vector<1x32xf32>
    %cst_31 = arith.constant dense<0.000000e+00> : vector<16xf32>
    %50 = vector.multi_reduction <add>, %47, %cst_31 [1] : vector<16x32xf32> to vector<16xf32>
    %51 = vector.shape_cast %50 : vector<16xf32> to vector<16x1xf32>
    %cst_32 = arith.constant 3.200000e+01 : f32
    %52 = vector.broadcast %cst_32 : f32 to vector<16x1xf32>
    %53 = arith.divf %51, %52 : vector<16x1xf32>
    %54 = arith.mulf %47, %47 : vector<16x32xf32>
    %cst_33 = arith.constant dense<0.000000e+00> : vector<16xf32>
    %55 = vector.multi_reduction <add>, %54, %cst_33 [1] : vector<16x32xf32> to vector<16xf32>
    %56 = vector.shape_cast %55 : vector<16xf32> to vector<16x1xf32>
    %cst_34 = arith.constant 3.200000e+01 : f32
    %57 = vector.broadcast %cst_34 : f32 to vector<16x1xf32>
    %58 = arith.divf %56, %57 : vector<16x1xf32>
    %59 = arith.mulf %53, %53 : vector<16x1xf32>
    %60 = arith.subf %58, %59 : vector<16x1xf32>
    %cst_35 = arith.constant 0.000000e+00 : f32
    %61 = vector.broadcast %cst_35 : f32 to vector<16x1xf32>
    %62 = arith.maximumf %60, %61 : vector<16x1xf32>
    %63 = vector.broadcast %53 : vector<16x1xf32> to vector<16x32xf32>
    %64 = arith.subf %47, %63 : vector<16x32xf32>
    %cst_36 = arith.constant 9.99999974E-6 : f32
    %65 = vector.broadcast %cst_36 : f32 to vector<16x1xf32>
    %66 = arith.addf %62, %65 : vector<16x1xf32>
    %67 = math.rsqrt %66 : vector<16x1xf32>
    %68 = vector.broadcast %67 : vector<16x1xf32> to vector<16x32xf32>
    %69 = arith.mulf %64, %68 : vector<16x32xf32>
    %70 = vector.broadcast %48 : vector<1x32xf32> to vector<16x32xf32>
    %71 = arith.mulf %69, %70 : vector<16x32xf32>
    %72 = vector.broadcast %49 : vector<1x32xf32> to vector<16x32xf32>
    %73 = arith.addf %71, %72 : vector<16x32xf32>
    %c0_37 = arith.constant 0 : index
    %c0_38 = arith.constant 0 : index
    %74 = vector.load %arg10[%c0_37, %c0_38] : memref<32x32xf32, #tpu.memory_space<vmem>>, vector<32x32xf32>
    %cst_39 = arith.constant dense<0.000000e+00> : vector<16x32xf32>
    %75 = tpu.matmul %73, %74, %cst_39 {dimension_numbers = #tpu.dot_dimension_numbers<[1], [0], [0], [1], [0, 0, 1, 1], [], []>} : vector<16x32xf32>, vector<32x32xf32>, vector<16x32xf32> -> vector<16x32xf32>
    %c0_40 = arith.constant 0 : index
    %c0_41 = arith.constant 0 : index
    %76 = vector.load %arg11[%c0_40, %c0_41] : memref<1x32xf32, #tpu.memory_space<vmem>>, vector<1x32xf32>
    %77 = vector.broadcast %76 : vector<1x32xf32> to vector<16x32xf32>
    %78 = arith.addf %75, %77 : vector<16x32xf32>
    %cst_42 = arith.constant 5.000000e-01 : f32
    %79 = vector.broadcast %cst_42 : f32 to vector<16x32xf32>
    %80 = arith.mulf %79, %78 : vector<16x32xf32>
    %cst_43 = arith.constant 0.707106769 : f32
    %81 = vector.broadcast %cst_43 : f32 to vector<16x32xf32>
    %82 = arith.mulf %78, %81 : vector<16x32xf32>
    %83 = math.erf %82 : vector<16x32xf32>
    %cst_44 = arith.constant 1.000000e+00 : f32
    %84 = vector.broadcast %cst_44 : f32 to vector<16x32xf32>
    %85 = arith.addf %84, %83 : vector<16x32xf32>
    %86 = arith.mulf %80, %85 : vector<16x32xf32>
    %c0_45 = arith.constant 0 : index
    %c0_46 = arith.constant 0 : index
    %87 = vector.load %arg12[%c0_45, %c0_46] : memref<32x32xf32, #tpu.memory_space<vmem>>, vector<32x32xf32>
    %cst_47 = arith.constant dense<0.000000e+00> : vector<16x32xf32>
    %88 = tpu.matmul %86, %87, %cst_47 {dimension_numbers = #tpu.dot_dimension_numbers<[1], [0], [0], [1], [0, 0, 1, 1], [], []>} : vector<16x32xf32>, vector<32x32xf32>, vector<16x32xf32> -> vector<16x32xf32>
    %c0_48 = arith.constant 0 : index
    %c0_49 = arith.constant 0 : index
    %89 = vector.load %arg13[%c0_48, %c0_49] : memref<1x32xf32, #tpu.memory_space<vmem>>, vector<1x32xf32>
    %90 = vector.broadcast %89 : vector<1x32xf32> to vector<16x32xf32>
    %91 = arith.addf %88, %90 : vector<16x32xf32>
    %92 = arith.addf %47, %91 : vector<16x32xf32>
    %c0_50 = arith.constant 0 : index
    %c0_51 = arith.constant 0 : index
    %93 = vector.load %arg14[%c0_50, %c0_51] : memref<16x32xf32, #tpu.memory_space<vmem>>, vector<16x32xf32>
    tpu.vector_store %arg14[%c0_50, %c0_51], %92 {strides = array<i32>} : memref<16x32xf32, #tpu.memory_space<vmem>>, vector<16x32xf32>,
    return
  }
  func.func @transform_0(%arg0: i32) -> (i32, i32) {
    %c0_i32 = arith.constant 0 : i32
    %c0_i32_0 = arith.constant 0 : i32
    return %arg0, %c0_i32 : i32, i32
  }
  func.func @transform_1(%arg0: i32) -> (i32, i32) {
    %c0_i32 = arith.constant 0 : i32
    %c0_i32_0 = arith.constant 0 : i32
    %c0_i32_1 = arith.constant 0 : i32
    return %c0_i32, %c0_i32_0 : i32, i32
  }
  func.func @transform_2(%arg0: i32) -> (i32, i32) {
    %c0_i32 = arith.constant 0 : i32
    %c0_i32_0 = arith.constant 0 : i32
    %c0_i32_1 = arith.constant 0 : i32
    return %c0_i32, %c0_i32_0 : i32, i32
  }
  func.func @transform_3(%arg0: i32) -> (i32, i32) {
    %c0_i32 = arith.constant 0 : i32
    %c0_i32_0 = arith.constant 0 : i32
    %c0_i32_1 = arith.constant 0 : i32
    return %c0_i32, %c0_i32_0 : i32, i32
  }
  func.func @transform_4(%arg0: i32) -> (i32, i32) {
    %c0_i32 = arith.constant 0 : i32
    %c0_i32_0 = arith.constant 0 : i32
    %c0_i32_1 = arith.constant 0 : i32
    return %c0_i32, %c0_i32_0 : i32, i32
  }
  func.func @transform_5(%arg0: i32) -> (i32, i32) {
    %c0_i32 = arith.constant 0 : i32
    %c0_i32_0 = arith.constant 0 : i32
    %c0_i32_1 = arith.constant 0 : i32
    return %c0_i32, %c0_i32_0 : i32, i32
  }
  func.func @transform_6(%arg0: i32) -> (i32, i32) {
    %c0_i32 = arith.constant 0 : i32
    %c0_i32_0 = arith.constant 0 : i32
    %c0_i32_1 = arith.constant 0 : i32
    return %c0_i32, %c0_i32_0 : i32, i32
  }
  func.func @transform_7(%arg0: i32) -> (i32, i32) {
    %c0_i32 = arith.constant 0 : i32
    %c0_i32_0 = arith.constant 0 : i32
    %c0_i32_1 = arith.constant 0 : i32
    return %c0_i32, %c0_i32_0 : i32, i32
  }
  func.func @transform_8(%arg0: i32) -> (i32, i32) {
    %c0_i32 = arith.constant 0 : i32
    %c0_i32_0 = arith.constant 0 : i32
    %c0_i32_1 = arith.constant 0 : i32
    return %c0_i32, %c0_i32_0 : i32, i32
  }
  func.func @transform_9(%arg0: i32) -> (i32, i32) {
    %c0_i32 = arith.constant 0 : i32
    %c0_i32_0 = arith.constant 0 : i32
    %c0_i32_1 = arith.constant 0 : i32
    return %c0_i32, %c0_i32_0 : i32, i32
  }
  func.func @transform_10(%arg0: i32) -> (i32, i32) {
    %c0_i32 = arith.constant 0 : i32
    %c0_i32_0 = arith.constant 0 : i32
    %c0_i32_1 = arith.constant 0 : i32
    return %c0_i32, %c0_i32_0 : i32, i32
  }
  func.func @transform_11(%arg0: i32) -> (i32, i32) {
    %c0_i32 = arith.constant 0 : i32
    %c0_i32_0 = arith.constant 0 : i32
    %c0_i32_1 = arith.constant 0 : i32
    return %c0_i32, %c0_i32_0 : i32, i32
  }
  func.func @transform_12(%arg0: i32) -> (i32, i32) {
    %c0_i32 = arith.constant 0 : i32
    %c0_i32_0 = arith.constant 0 : i32
    %c0_i32_1 = arith.constant 0 : i32
    return %c0_i32, %c0_i32_0 : i32, i32
  }
  func.func @transform_13(%arg0: i32) -> (i32, i32) {
    %c0_i32 = arith.constant 0 : i32
    %c0_i32_0 = arith.constant 0 : i32
    return %arg0, %c0_i32 : i32, i32
  }
}

</mosaic_0001>

<bundles_post_ra>
// kernel: mixer_layer.1
= control target key start
LH: loop header
LB: loop body
LE: loop exit
PB: predicated region body
PF: predicated region fallthrough
CT: control target
= control target key end

     0   :  { %s1603_s0 = inlined_call_operand.hbm [shape: f32[128,32], index: 0, kind: input, shape index: {}]   ;;  %s1604_s1 = inlined_call_operand.vmem [shape: f32[1,32], index: 1, kind: input, shape index: {}]   ;;  %s1605_s2 = inlined_call_operand.vmem [shape: f32[1,32], index: 2, kind: input, shape index: {}]   ;;  %s1606_s3 = inlined_call_operand.vmem [shape: f32[1,32], index: 3, kind: input, shape index: {}]   ;;  %s1607_s4 = inlined_call_operand.vmem [shape: f32[1,32], index: 4, kind: input, shape index: {}]   ;;  %s1608_s5 = inlined_call_operand.vmem [shape: f32[16,16], index: 5, kind: input, shape index: {}]   ;;  %s1609_s6 = inlined_call_operand.vmem [shape: f32[16,1], index: 6, kind: input, shape index: {}]   ;;  %s1610_s7 = inlined_call_operand.vmem [shape: f32[16,16], index: 7, kind: input, shape index: {}]   ;;  %s1611_s8 = inlined_call_operand.vmem [shape: f32[16,1], index: 8, kind: input, shape index: {}]   ;;  %s1612_s9 = inlined_call_operand.vmem [shape: f32[32,32], index: 9, kind: input, shape index: {}]   ;;  %s1613_s10 = inlined_call_operand.vmem [shape: f32[1,32], index: 10, kind: input, shape index: {}]   ;;  %s1614_s11 = inlined_call_operand.vmem [shape: f32[32,32], index: 11, kind: input, shape index: {}]   ;;  %s1615_s12 = inlined_call_operand.vmem [shape: f32[1,32], index: 12, kind: input, shape index: {}]   ;;  %s1616_s13 = inlined_call_operand.hbm [shape: f32[128,32], index: 13, kind: output, shape index: {}]  }
   0x1   :  { %1625 = sst [smem:[#allocation15_spill]] %s1616_s13 }
   0x2   :  { %18 = vsyncpa [#allocation4], 0 }
   0x3   :  { %20 = vsyncpa [#allocation4 + $0x1], 0 }
   0x4   :  { %21 = vsyncpa [#allocation5], 0 }
   0x5   :  { %23 = vsyncpa [#allocation5 + $0x1], 0  ;;  %s1314_s25 = smov 0   ;;  %s1316_s26 = smov 0  }
   0x6   :  { %s1318_s27 = smov 0   ;;  %s1320_s28 = smov 0  }
   0x7 LB: > { %1626 = sst [smem:[#allocation9_spill]] %s1224_s25  ;;  %s1335_s29 = sadd.s32 4294967295, %s1236_s28   ;;  %s1236_s28 = sphi %s1320_s28, %s1641_s28   ;;  %s1232_s27 = sphi %s1318_s27, %s1646_s27   ;;  %s1228_s26 = sphi %s1316_s26, %s1645_s26   ;;  %s1224_s25 = sphi %s1314_s25, %s1644_s25  }
   0x8   : > { %1627 = sst [smem:[#allocation10_spill]] %s1232_s27  ;;  %s1033_s30 = sadd.s32 4294967294, %s1236_s28  }
   0x9   : > { %s1339_s14 = sadd.s32 1, %s1236_s28   ;;  %s36_s15 = sadd.s32 1, %s1232_s27 }
   0xa   : > { %1628 = sst [smem:[#allocation11_spill]] %s1339_s14  ;;  %s33_s16 = ssub.s32 %s1236_s28, %s1339_s14 }
   0xb   : > { %p43_p0 = scmp.ne.s32.totalorder %s1232_s27, %s1228_s26  ;;  %p34_p1 = scmp.eq.s32.totalorder %s33_s16, 0 }
   0xc   : > { %p44_p2 = scmp.eq.s32.totalorder %s1236_s28, 0  ;;  %p49_p3 = scmp.ne.s32.totalorder %s1228_s26, %s1224_s25 }
   0xd   : > { %p50_p4 = scmp.eq.s32.totalorder %s1335_s29, 0  ;;  %p325_p7 = scmp.eq.s32.totalorder %s1335_s29, 7 }
   0xe   : > { %s1351_s17 = scalar_select %p34_p1, %s1232_s27, %s36_s15  }
   0xf   : > { %p1353_p5 = por %p44_p2, %p43_p0  ;;  %p1357_p6 = por %p50_p4, %p49_p3 }
  0x10   : > { %1629 = sst [smem:[#allocation12_spill]] %s1351_s17  ;;  %p331_p8 = scmp.eq.s32.totalorder %s1033_s30, 7 }
  0x11   : > { %p1073_p9 = scmp.lt.s32.totalorder %s1236_s28, 8  ;;  %p1363_p10 = por %p325_p7, %p43_p0 }
  0x12   : > { %p1367_p11 = por %p331_p8, %p49_p3  ;;  %s387_s22 = sand.u32 1, %s1232_s27  }
  0x13   : > { %s1632_s20 = scalar_select %p1363_p10, 1, 0 }
  0x14   : > { %s1634_s21 = scalar_select %p1367_p11, 1, 0 }
  0x15   : > { %1633 = sst [smem:[#allocation13_spill]] %s1632_s20  ;;  %s1059_s23 = sshll.u32 %s1236_s28, 4 }
  0x16   : > { %1635 = sst [smem:[#allocation14_spill]] %s1634_s21  ;;  %s1036_s24 = sshll.u32 %s387_s22, 4 }
  0x17   : > { %s396_s17 = scalar_lea.hbm %s1603_s0, %s1059_s23  ;;  %s391_s25 = scalar_lea.vmem [#allocation3], %s1036_s24 }
  0x18   : > { %s397_s14 = sshll.u32 %s396_s17, 4  ;;  %s399_s13 = sshll.u32 %s391_s25, 4  ;;  %s398_s14 = int_to_ptr.hbm [resolvable:$true] %s397_s14  ;;  %s400_s13 = int_to_ptr.vmem [resolvable:$true] %s399_s13 }
  0x19   : > { %p1378_p12 = pnand %p1073_p9, %p1353_p5  ;;  %p1039_p13 = scmp.ge.s32.totalorder %s1236_s28, 1 }
  0x1a   : > { %p407_p0 = scmp.lt.s32.totalorder %s1236_s28, 9  ;;  %s388_s27 = scalar_lea.sflag [#allocation4], %s387_s22 }
  0x1b   : > { %s1140_s21 = sshra.s32 %s398_s14, 4  ;;  %p1144_p2 = pneg %p1378_p12  ;;  %s1141_s21 = int_to_ptr.hbm [resolvable:$true] %s1140_s21 }
  0x1c   : > { %s1142_s20 = scalar_lea.hbm %s1141_s21, 16  ;;  %s1147_s18 = scalar_lea.hbm %s1603_s0, 128 }
  0x1d   : > { %p1143_p1 = scmp.ne.s32.totalorder %s1141_s21, %s1142_s20  ;;  %p1148_p5 = scmp.lt.s32.totalorder %s1141_s21, %s1603_s0 }
  0x1e   : > { %p1149_p7 = scmp.lt.s32.totalorder %s1147_s18, %s1142_s20 }
  0x1f   : > { %p1145_p3 = pnand %p1144_p2, %p1143_p1 }
  0x20   : > { %p1150_p8 = por %p1149_p7, %p1148_p5 }
  0x21   : > { %p1146_p4 = pneg %p1145_p3 }
  0x23   : > { %p1151_p9 = pnand %p1150_p8, %p1146_p4 }
  0x25   : > { %1154 = shalt.err (!%p1151_p9)
}
  0x26   : > { %s1238_s22 = smov 128   ;;  %s1239_s15 = smov 8  }
  0x27   : > { %1068 = dma.hbm_to_vmem [thread:$0]  (!%p1378_p12), %s398_s14, 256, %s400_s13, %s388_s27, %s1238_s22, %s1238_s22, %s1239_s15  }
  0x28   : > { %p408_p1 = pnand %p1039_p13, %p407_p0 }
  0x29   : > { %s1399_s16 = sand.u32 (!%p408_p1), 1, %s1228_s26  }
  0x2a   : > { %411 = sbr.rel (%p408_p1) target bundleno = 1021 (0x3fd), region = 72  ;;  %s1040_s20 = sshll.u32 (!%p408_p1), %s1399_s16, 4 }
  0x2b   : > { %s414_s21 = scalar_lea.sflag (!%p408_p1), [#allocation4], %s1399_s16  ;;  %s417_s25 = scalar_lea.vmem (!%p408_p1), [#allocation3], %s1040_s20 }
  0x2f   : > { %1215 = dma.done.wait (%p1357_p6), %s414_s21, 256  }
  0x30   : > { %1217 = vsyncadd (%p1357_p6), %s414_s21, 4294967040  ;;  %vm467_vm0 = vcmask 261120   ;;  %v1409_v0 = vld [vmem:[%s417_s25 + $0x8] sm:$0xff]  ;;  %v1415_v3 = vld [vmem:[%s417_s25] sm:$0xff]  ;;  %v1240_v8 = vmov 32.0   ;;  %v1241_v36 = vmov 0  }
  0x31   : > { %v471_v1 = vsel %vm467_vm0, %v1409_v0, 0.0  ;;  %v484_v2 = vmul.f32 %v1409_v0, %v1409_v0  ;;  %v483_v5 = vmul.f32 %v1415_v3, %v1415_v3  ;;  %v468_v6 = vsel %vm467_vm0, %v1415_v3, 0.0  ;;  %v538_v34 = vld [vmem:[%s1609_s6 + $0x8] sm:$0xff]  ;;  %1113 = vset.pattern.permute.xlu2 %v1241_v36  ;;  %1114 = vset.pattern.permute.xlu0 %v1241_v36  ;;  %v1116_v42 = vld [vmem:[%s1604_s1] ss:$0 sm:$0xff]  ;;  %s1060_s17 = sshll.u32 %s1335_s29, 4 }
  0x32   : > { %472 = vadd.xlane.f32.xlu0 %v471_v1  ;;  %1122 = vrcp.f32 %v1240_v8  ;;  %546 = vperm.xlu2 %1113, %v538_v34   ;;  %v537_v44 = vld [vmem:[%s1609_s6] sm:$0xff]  ;;  %vm549_vm8 = vcmask 130048   ;;  %v536_v59 = vld [vmem:[%s1608_s5 + $0x8] sm:$0xff]  ;;  %s460_s18 = scalar_lea.vmem [#allocation6], %s1040_s20  ;;  %s1638_s15 = sld [smem:[#allocation15_spill]] }
  0x33   : > { %v488_v4 = vsel %vm467_vm0, %v484_v2, 0.0  ;;  %v485_v7 = vsel %vm467_vm0, %v483_v5, 0.0  ;;  %1115 = vset.pattern.permute.xlu1 %v1241_v36  ;;  %v1117_v47 = vld [vmem:[%s1605_s2] ss:$0 sm:$0xff]  ;;  %s957_s25 = sshll.u32 %s460_s18, 4  ;;  %s945_s29 = scalar_lea.sflag [#allocation5], %s1399_s16  ;;  %s958_s25 = int_to_ptr.vmem [resolvable:$true] %s957_s25 }
  0x34   : > { %489 = vadd.xlane.f32.xlu1 %v488_v4  ;;  %v535_v58 = vld [vmem:[%s1608_s5] sm:$0xff] }
  0x38   : > { %v1123_v9 = vpop.eup %1122  ;;  %s956_s21 = scalar_lea.hbm %s1638_s15, %s1060_s17  ;;  %s1190_s30 = scalar_lea.hbm %s1638_s15, 128 }
  0x39   : > { %v475_v10 = vmul.f32 32.0, %v1123_v9  ;;  %vm479_vm1 = vweird.f32 %v1123_v9  ;;  %s959_s13 = sshll.u32 %s956_s21, 4  ;;  %s960_s13 = int_to_ptr.hbm [resolvable:$true] %s959_s13 }
  0x3a   : > { %469 = vadd.xlane.f32.xlu0 %v468_v6  ;;  %541 = vperm.xlu2 %1113, %v537_v44   ;;  %s1184_s27 = sshra.s32 %s960_s13, 4  ;;  %s1185_s27 = int_to_ptr.hbm [resolvable:$true] %s1184_s27 }
  0x3b   : > { %v476_v11 = vsub.f32 1.0, %v475_v10  ;;  %s1186_s20 = scalar_lea.hbm %s1185_s27, 16  ;;  %p1191_p0 = scmp.lt.s32.totalorder %s1185_s27, %s1638_s15 }
  0x3c   : > { %486 = vadd.xlane.f32.xlu1 %v485_v7  ;;  %p1187_p6 = scmp.ne.s32.totalorder %s1185_s27, %s1186_s20  ;;  %p1192_p2 = scmp.lt.s32.totalorder %s1190_s30, %s1186_s20 }
  0x3d   : > { %v477_v12 = vmul.f32 %v1123_v9, %v476_v11 }
  0x3e   : > { %p1188_p12 = pnand %p1187_p6, %p1363_p10  ;;  %p1193_p3 = por %p1192_p2, %p1191_p0 }
  0x3f   : > { %v478_v13 = vadd.f32 %v1123_v9, %v477_v12 }
  0x40   : > { %p1189_p13 = pneg %p1188_p12 }
  0x41   : > { %v1423_v14 = vsel %vm479_vm1, %v1123_v9, %v478_v13 }
  0x42   : > { %p1194_p4 = pnand %p1193_p3, %p1189_p13 }
  0x8c   : > { %v547_v60 = vpop.permute.xlu2 %546 }
  0x94   : > { %v542_v61 = vpop.permute.xlu2 %541 }
  0xa5   : > { %v473_v15 = vpop.xlane.xlu0 %472 }
  0xa6   : > { %v482_v16 = vmul.f32 %v1423_v14, %v473_v15 }
  0xa7   : > { %v490_v17 = vpop.xlane.xlu1 %489 }
  0xa8   : > { %v494_v18 = vmul.f32 %v482_v16, %v482_v16  ;;  %v492_v19 = vmul.f32 %v490_v17, %v1423_v14  ;;  %v500_v40 = vsub.f32 %v1409_v0, %v482_v16 }
  0xaa   : > { %v496_v20 = vsub.f32 %v492_v19, %v494_v18 }
  0xac   : > { %v498_v21 = vmax.f32 %v496_v20, 0.0 }
  0xad   : > { %v470_v22 = vpop.xlane.xlu0 %469 }
  0xae   : > { %v502_v23 = vadd.f32 1e-05, %v498_v21  ;;  %v481_v24 = vmul.f32 %v1423_v14, %v470_v22 }
  0xaf   : > { %v487_v25 = vpop.xlane.xlu1 %486 }
  0xb0   : > { %1124 = vrsqrt.f32 %v502_v23  ;;  %v493_v26 = vmul.f32 %v481_v24, %v481_v24  ;;  %v491_v27 = vmul.f32 %v487_v25, %v1423_v14  ;;  %vm519_vm3 = vweird.f32 %v502_v23 }
  0xb1   : > { %v499_v53 = vsub.f32 %v1415_v3, %v481_v24 }
  0xb2   : > { %v495_v28 = vsub.f32 %v491_v27, %v493_v26 }
  0xb4   : > { %v497_v29 = vmax.f32 %v495_v28, 0.0 }
  0xb6   : > { %v1125_v30 = vpop.eup %1124  ;;  %v501_v32 = vadd.f32 1e-05, %v497_v29 }
  0xb7   : > { %v514_v31 = vmul.f32 %v1125_v30, %v502_v23  ;;  %vm520_vm2 = vweird.f32 %v1125_v30 }
  0xb8   : > { %1126 = vrsqrt.f32 %v501_v32  ;;  %vm521_vm4 = vmor %vm519_vm3, %vm520_vm2  ;;  %vm509_vm6 = vweird.f32 %v501_v32 }
  0xb9   : > { %v515_v33 = vmul.f32 %v1125_v30, %v514_v31 }
  0xbb   : > { %v516_v35 = vmul.f32 0.5, %v515_v33 }
  0xbd   : > { %v517_v37 = vsub.f32 1.5, %v516_v35 }
  0xbe   : > { %v1127_v38 = vpop.eup %1126 }
  0xbf   : > { %v518_v39 = vmul.f32 %v1125_v30, %v517_v37  ;;  %v504_v41 = vmul.f32 %v1127_v38, %v501_v32  ;;  %vm510_vm5 = vweird.f32 %v1127_v38 }
  0xc0   : > { %vm511_vm7 = vmor %vm509_vm6, %vm510_vm5 }
  0xc1   : > { %v522_v43 = vsel %vm521_vm4, %v1125_v30, %v518_v39  ;;  %v505_v45 = vmul.f32 %v1127_v38, %v504_v41 }
  0xc2   : > { %v524_v46 = vmul.f32 %v522_v43, %v500_v40 }
  0xc3   : > { %v506_v48 = vmul.f32 0.5, %v505_v45 }
  0xc4   : > { %v529_v49 = vmul.f32 %v1116_v42, %v524_v46 }
  0xc5   : > { %v507_v50 = vsub.f32 1.5, %v506_v48 }
  0xc6   : > { %v534_v51 = vadd.f32 %v1117_v47, %v529_v49 }
  0xc7   : > { %v508_v52 = vmul.f32 %v1127_v38, %v507_v50 }
  0xc8   : > { %570 = vmatpush.msra.mxu0 %v534_v51 }
  0xc9   : > { %v512_v54 = vsel %vm511_vm7, %v1127_v38, %v508_v52  ;;  %v669_v52 = vld [vmem:[%s1611_s8] sm:$0xff] }
  0xca   : > { %v523_v55 = vmul.f32 %v512_v54, %v499_v53  ;;  %v670_v53 = vld [vmem:[%s1611_s8 + $0x8] sm:$0xff]  ;;  %673 = vperm.xlu0 %1114, %v669_v52  }
  0xcb   : > { %678 = vperm.xlu1 %1115, %v670_v53  }
  0xcc   : > { %v528_v56 = vmul.f32 %v1116_v42, %v523_v55 }
  0xce   : > { %v533_v57 = vadd.f32 %v1117_v47, %v528_v56 }
  0xd0   : > { %571 = vmatpush.msra.mxu0 %v533_v57 }
  0xd1   : > { %1042 = vmatmul.msk.f32.vlgmr.msra.gmra.mxu0 %vm549_vm8, %v535_v58 }
  0xd9   : > { %1043 = vmatmul.msk.f32.gmra.mxu0 %vm549_vm8, %v536_v59 }
 0x14e   : > { %v573_v62 = vpop.f32.mrf.mxu0 }
 0x14f   : > { %v1451_v63 = vadd.f32 %v573_v62, %v542_v61 }
 0x151   : > { %v1454_v1 = vmul.f32 0.70710677, %v1451_v63 }
 0x153   : > { %v583_v2 = vmul.f32 %v1454_v1, %v1454_v1 }
 0x155   : > { %v584_v4 = vmin.f32 %v583_v2, 16.0 }
 0x156   : > { %v576_v5 = vpop.f32.mrf.mxu0 }
 0x157   : > { %v585_v6 = vmul.f32 2.1237322e-06, %v584_v4  ;;  %v1458_v7 = vadd.f32 %v576_v5, %v547_v60  ;;  %v596_v8 = vmul.f32 3.8918573e-05, %v584_v4 }
 0x159   : > { %v586_v9 = vadd.f32 0.00028619796, %v585_v6  ;;  %v1461_v10 = vmul.f32 0.70710677, %v1458_v7  ;;  %v597_v11 = vadd.f32 0.001143296, %v596_v8 }
 0x15b   : > { %v623_v12 = vmul.f32 %v1461_v10, %v1461_v10  ;;  %v598_v13 = vmul.f32 %v597_v11, %v584_v4  ;;  %v587_v15 = vmul.f32 %v586_v9, %v584_v4 }
 0x15d   : > { %v624_v16 = vmin.f32 %v623_v12, 16.0  ;;  %v599_v17 = vadd.f32 0.014752088, %v598_v13  ;;  %v588_v21 = vadd.f32 0.0036580483, %v587_v15 }
 0x15f   : > { %v625_v18 = vmul.f32 2.1237322e-06, %v624_v16  ;;  %v636_v19 = vmul.f32 3.8918573e-05, %v624_v16  ;;  %v600_v20 = vmul.f32 %v599_v17, %v584_v4  ;;  %v589_v28 = vmul.f32 %v588_v21, %v584_v4 }
 0x161   : > { %v626_v22 = vadd.f32 0.00028619796, %v625_v18  ;;  %v637_v23 = vadd.f32 0.001143296, %v636_v19  ;;  %v601_v24 = vadd.f32 0.112945676, %v600_v20 }
 0x162   : > { %v590_v34 = vadd.f32 0.05243302, %v589_v28 }
 0x163   : > { %v627_v25 = vmul.f32 %v626_v22, %v624_v16  ;;  %v638_v26 = vmul.f32 %v637_v23, %v624_v16  ;;  %v602_v27 = vmul.f32 %v601_v24, %v584_v4  ;;  %v579_v24 = vmul.f32 0.5, %v1451_v63 }
 0x164   : > { %v591_v39 = vmul.f32 %v590_v34, %v584_v4 }
 0x165   : > { %v639_v29 = vadd.f32 0.014752088, %v638_v26  ;;  %v628_v30 = vadd.f32 0.0036580483, %v627_v25  ;;  %v603_v31 = vadd.f32 0.4994258, %v602_v27 }
 0x166   : > { %v592_v43 = vadd.f32 0.18741608, %v591_v39  ;;  %v667_v27 = vld [vmem:[%s1610_s7] sm:$0xff] }
 0x167   : > { %v640_v32 = vmul.f32 %v639_v29, %v624_v16  ;;  %v604_v33 = vmul.f32 %v603_v31, %v584_v4  ;;  %v629_v36 = vmul.f32 %v628_v30, %v624_v16  ;;  %v679_v30 = vpop.permute.xlu1 %678 }
 0x168   : > { %v593_v48 = vmul.f32 %v592_v43, %v584_v4 }
 0x169   : > { %v641_v35 = vadd.f32 0.112945676, %v640_v32  ;;  %v605_v37 = vadd.f32 1.0, %v604_v33  ;;  %v630_v41 = vadd.f32 0.05243302, %v629_v36 }
 0x16a   : > { %v594_v57 = vadd.f32 1.1283791, %v593_v48  ;;  %v778_v48 = vld [vmem:[%s1612_s9] sm:$0xff] }
 0x16b   : > { %v642_v38 = vmul.f32 %v641_v35, %v624_v16  ;;  %1128 = vrcp.f32 %v605_v37  ;;  %v631_v46 = vmul.f32 %v630_v41, %v624_v16  ;;  %v617_v51 = vand.u32 2147483648, %v605_v37  ;;  %v780_v41 = vld [vmem:[%s1612_s9 + $0x10] sm:$0xff] }
 0x16c   : > { %v615_v55 = vand.u32 2147483647, %v605_v37  ;;  %vm611_vm10 = vweird.f32 %v605_v37  ;;  %v595_v4 = vmul.f32 %v594_v57, %v1454_v1  ;;  %v580_v1 = vmul.f32 0.5, %v1458_v7  ;;  %v674_v7 = vpop.permute.xlu0 %673 }
 0x16d   : > { %v643_v40 = vadd.f32 0.4994258, %v642_v38  ;;  %v632_v49 = vadd.f32 0.18741608, %v631_v46  ;;  %v618_v61 = vor.u32 1.1754944e-38, %v617_v51 }
 0x16e   : > { %vm616_vm12 = vcmp.eq.f32.partialorder %v615_v55, 8.507059e+37 }
 0x16f   : > { %v644_v42 = vmul.f32 %v643_v40, %v624_v16  ;;  %v633_v58 = vmul.f32 %v632_v49, %v624_v16  ;;  %v781_v40 = vld [vmem:[%s1612_s9 + $0x18] sm:$0xff] }
 0x170   : > { %804 = vmatpush.msra.mxu2 %v781_v40 }
 0x171   : > { %v645_v44 = vadd.f32 1.0, %v644_v42  ;;  %v1129_v45 = vpop.eup %1128  ;;  %v634_v8 = vadd.f32 1.1283791, %v633_v58 }
 0x172   : > { %v607_v47 = vmul.f32 %v1129_v45, %v605_v37  ;;  %vm612_vm9 = vweird.f32 %v1129_v45  ;;  %805 = vmatpush.msra.mxu2 %v780_v41  ;;  %v906_v41 = vld [vmem:[%s1614_s11 + $0x18] sm:$0xff] }
 0x173   : > { %1130 = vrcp.f32 %v645_v44  ;;  %vm613_vm11 = vmor %vm611_vm10, %vm612_vm9  ;;  %v657_v5 = vand.u32 2147483648, %v645_v44  ;;  %v655_v11 = vand.u32 2147483647, %v645_v44  ;;  %vm651_vm14 = vweird.f32 %v645_v44  ;;  %929 = vmatpush.msra.mxu3 %v906_v41 }
 0x174   : > { %v608_v50 = vsub.f32 1.0, %v607_v47  ;;  %v635_v16 = vmul.f32 %v634_v8, %v1461_v10  ;;  %v668_v10 = vld [vmem:[%s1610_s7 + $0x8] sm:$0xff] }
 0x175   : > { %v658_v15 = vor.u32 1.1754944e-38, %v657_v5  ;;  %vm656_vm1 = vcmp.eq.f32.partialorder %v655_v11, 8.507059e+37 }
 0x176   : > { %v609_v54 = vmul.f32 %v1129_v45, %v608_v50 }
 0x178   : > { %v610_v60 = vadd.f32 %v1129_v45, %v609_v54 }
 0x179   : > { %v1131_v56 = vpop.eup %1130 }
 0x17a   : > { %v647_v59 = vmul.f32 %v1131_v56, %v645_v44  ;;  %v614_v2 = vsel %vm613_vm11, %v1129_v45, %v610_v60  ;;  %vm652_vm13 = vweird.f32 %v1131_v56  ;;  %v779_v44 = vld [vmem:[%s1612_s9 + $0x8] sm:$0xff] }
 0x17b   : > { %v619_v6 = vsel %vm616_vm12, %v618_v61, %v614_v2  ;;  %vm653_vm15 = vmor %vm651_vm14, %vm652_vm13  ;;  %806 = vmatpush.msra.mxu2 %v779_v44 }
 0x17c   : > { %v648_v62 = vsub.f32 1.0, %v647_v59  ;;  %v620_v13 = vmul.f32 %v619_v6, %v595_v4 }
 0x17d   : > { %807 = vmatpush.msra.mxu2 %v778_v48 }
 0x17e   : > { %v649_v9 = vmul.f32 %v1131_v56, %v648_v62  ;;  %v1044_v20 = vclamps-f32 %v620_v13, 1.0 }
 0x180   : > { %v650_v12 = vadd.f32 %v1131_v56, %v649_v9  ;;  %v663_v23 = vadd.f32 1.0, %v1044_v20 }
 0x182   : > { %v654_v17 = vsel %vm653_vm15, %v1131_v56, %v650_v12  ;;  %v665_v26 = vmul.f32 %v663_v23, %v579_v24 }
 0x183   : > { %v659_v18 = vsel %vm656_vm1, %v658_v15, %v654_v17  ;;  %v1119_v15 = vld [vmem:[%s1607_s4] ss:$0 sm:$0xff] }
 0x184   : > { %v660_v19 = vmul.f32 %v659_v18, %v635_v16 }
 0x186   : > { %v1045_v21 = vclamps-f32 %v660_v19, 1.0 }
 0x188   : > { %v664_v22 = vadd.f32 1.0, %v1045_v21 }
 0x18a   : > { %v666_v25 = vmul.f32 %v664_v22, %v580_v1 }
 0x18c   : > { %701 = vmatpush.msra.mxu1 %v666_v25  ;;  %v1120_v25 = vld [vmem:[%s1613_s10] ss:$0 sm:$0xff] }
 0x18e   : > { %702 = vmatpush.msra.mxu1 %v665_v26 }
 0x18f   : > { %1046 = vmatmul.msk.f32.vlgmr.msra.gmra.mxu1 %vm549_vm8, %v667_v27 }
 0x197   : > { %1047 = vmatmul.msk.f32.gmra.mxu1 %vm549_vm8, %v668_v10 }
 0x20c   : > { %v704_v28 = vpop.f32.mrf.mxu1 }
 0x20d   : > { %v705_v29 = vadd.f32 %v704_v28, %v674_v7 }
 0x20f   : > { %v710_v63 = vadd.f32 %v705_v29, %v1415_v3 }
 0x211   : > { %712 = vst.msk [vmem:[#allocation2] sm:$0xff] %vm467_vm0, %v710_v63 }
 0x214   : > { %v707_v31 = vpop.f32.mrf.mxu1 }
 0x215   : > { %v708_v32 = vadd.f32 %v707_v31, %v679_v30 }
 0x217   : > { %v711_v33 = vadd.f32 %v708_v32, %v1409_v0 }
 0x218   : > { %v1486_v34 = vld [vmem:[#allocation2] sm:$0xff] }
 0x219   : > { %713 = vst.msk [vmem:[#allocation2 + $0x8] sm:$0xff] %vm467_vm0, %v711_v33  ;;  %v718_v35 = vsel %vm467_vm0, %v1486_v34, 0.0  ;;  %v726_v36 = vmul.f32 %v1486_v34, %v1486_v34 }
 0x21a   : > { %719 = vadd.xlane.f32.xlu2 %v718_v35 }
 0x21b   : > { %v728_v3 = vsel %vm467_vm0, %v726_v36, 0.0 }
 0x21c   : > { %729 = vadd.xlane.f32.xlu1 %v728_v3 }
 0x220   : > { %v1494_v37 = vld [vmem:[#allocation2 + $0x8] sm:$0xff] }
 0x221   : > { %v721_v38 = vsel %vm467_vm0, %v1494_v37, 0.0  ;;  %v727_v0 = vmul.f32 %v1494_v37, %v1494_v37 }
 0x222   : > { %722 = vadd.xlane.f32.xlu0 %v721_v38 }
 0x223   : > { %v731_v39 = vsel %vm467_vm0, %v727_v0, 0.0 }
 0x224   : > { %732 = vadd.xlane.f32.xlu2 %v731_v39 }
 0x28d   : > { %v720_v42 = vpop.xlane.xlu2 %719 }
 0x28e   : > { %v724_v43 = vmul.f32 %v720_v42, %v1423_v14 }
 0x28f   : > { %v730_v45 = vpop.xlane.xlu1 %729 }
 0x290   : > { %v736_v46 = vmul.f32 %v724_v43, %v724_v43  ;;  %v734_v47 = vmul.f32 %v730_v45, %v1423_v14  ;;  %v742_v8 = vsub.f32 %v1486_v34, %v724_v43  ;;  %v905_v45 = vld [vmem:[%s1614_s11 + $0x10] sm:$0xff] }
 0x291   : > { %930 = vmatpush.msra.mxu3 %v905_v45 }
 0x292   : > { %v738_v49 = vsub.f32 %v734_v47, %v736_v46 }
 0x294   : > { %v740_v50 = vmax.f32 %v738_v49, 0.0 }
 0x295   : > { %v723_v51 = vpop.xlane.xlu0 %722 }
 0x296   : > { %v744_v52 = vadd.f32 1e-05, %v740_v50  ;;  %v725_v53 = vmul.f32 %v723_v51, %v1423_v14  ;;  %v904_v50 = vld [vmem:[%s1614_s11 + $0x8] sm:$0xff] }
 0x297   : > { %v733_v54 = vpop.xlane.xlu2 %732  ;;  %931 = vmatpush.msra.mxu3 %v904_v50 }
 0x298   : > { %1132 = vrsqrt.f32 %v744_v52  ;;  %v737_v55 = vmul.f32 %v725_v53, %v725_v53  ;;  %v735_v56 = vmul.f32 %v733_v54, %v1423_v14  ;;  %vm752_vm3 = vweird.f32 %v744_v52  ;;  %v1118_v14 = vld [vmem:[%s1606_s3] ss:$0 sm:$0xff] }
 0x299   : > { %v743_v21 = vsub.f32 %v1494_v37, %v725_v53  ;;  %v903_v54 = vld [vmem:[%s1614_s11] sm:$0xff] }
 0x29a   : > { %v739_v57 = vsub.f32 %v735_v56, %v737_v55  ;;  %932 = vmatpush.msra.mxu3 %v903_v54 }
 0x29c   : > { %v741_v58 = vmax.f32 %v739_v57, 0.0 }
 0x29e   : > { %v1133_v59 = vpop.eup %1132  ;;  %v745_v61 = vadd.f32 1e-05, %v741_v58 }
 0x29f   : > { %v747_v60 = vmul.f32 %v1133_v59, %v744_v52  ;;  %vm753_vm2 = vweird.f32 %v1133_v59 }
 0x2a0   : > { %1134 = vrsqrt.f32 %v745_v61  ;;  %vm754_vm4 = vmor %vm752_vm3, %vm753_vm2  ;;  %vm762_vm6 = vweird.f32 %v745_v61 }
 0x2a1   : > { %v748_v62 = vmul.f32 %v1133_v59, %v747_v60 }
 0x2a3   : > { %v749_v2 = vmul.f32 0.5, %v748_v62 }
 0x2a5   : > { %v750_v4 = vsub.f32 1.5, %v749_v2 }
 0x2a6   : > { %v1135_v5 = vpop.eup %1134 }
 0x2a7   : > { %v751_v6 = vmul.f32 %v1133_v59, %v750_v4  ;;  %v757_v9 = vmul.f32 %v1135_v5, %v745_v61  ;;  %vm763_vm5 = vweird.f32 %v1135_v5 }
 0x2a8   : > { %vm764_vm7 = vmor %vm762_vm6, %vm763_vm5 }
 0x2a9   : > { %v755_v11 = vsel %vm754_vm4, %v1133_v59, %v751_v6  ;;  %v758_v12 = vmul.f32 %v1135_v5, %v757_v9 }
 0x2aa   : > { %v766_v13 = vmul.f32 %v755_v11, %v742_v8 }
 0x2ab   : > { %v759_v16 = vmul.f32 0.5, %v758_v12 }
 0x2ac   : > { %v771_v17 = vmul.f32 %v1118_v14, %v766_v13 }
 0x2ad   : > { %v760_v18 = vsub.f32 1.5, %v759_v16 }
 0x2ae   : > { %v776_v19 = vadd.f32 %v1119_v15, %v771_v17 }
 0x2af   : > { %v761_v20 = vmul.f32 %v1135_v5, %v760_v18 }
 0x2b0   : > { %1048 = vmatmul.msk.f32.vlgmr.msra.gmra.mxu2 %vm467_vm0, %v776_v19 }
 0x2b1   : > { %v765_v1 = vsel %vm764_vm7, %v1135_v5, %v761_v20 }
 0x2b2   : > { %v767_v22 = vmul.f32 %v765_v1, %v743_v21 }
 0x2b4   : > { %v772_v23 = vmul.f32 %v1118_v14, %v767_v22 }
 0x2b6   : > { %v777_v24 = vadd.f32 %v1119_v15, %v772_v23 }
 0x2b8   : > { %1049 = vmatmul.msk.f32.gmra.mxu2 %vm467_vm0, %v777_v24 }
 0x333   : > { %v809_v26 = vpop.f32.mrf.mxu2 }
 0x334   : > { %v1530_v27 = vadd.f32 %v1120_v25, %v809_v26 }
 0x336   : > { %v1533_v10 = vmul.f32 0.70710677, %v1530_v27 }
 0x338   : > { %v819_v7 = vmul.f32 %v1533_v10, %v1533_v10 }
 0x33a   : > { %v820_v28 = vmin.f32 %v819_v7, 16.0 }
 0x33b   : > { %v812_v30 = vpop.f32.mrf.mxu2 }
 0x33c   : > { %v821_v29 = vmul.f32 2.1237322e-06, %v820_v28  ;;  %v832_v63 = vmul.f32 3.8918573e-05, %v820_v28  ;;  %v1537_v31 = vadd.f32 %v1120_v25, %v812_v30 }
 0x33e   : > { %v822_v32 = vadd.f32 0.00028619796, %v821_v29  ;;  %v833_v33 = vadd.f32 0.001143296, %v832_v63  ;;  %v1540_v35 = vmul.f32 0.70710677, %v1537_v31 }
 0x340   : > { %v823_v36 = vmul.f32 %v822_v32, %v820_v28  ;;  %v834_v3 = vmul.f32 %v833_v33, %v820_v28  ;;  %v859_v38 = vmul.f32 %v1540_v35, %v1540_v35 }
 0x342   : > { %v835_v0 = vadd.f32 0.014752088, %v834_v3  ;;  %v824_v39 = vadd.f32 0.0036580483, %v823_v36  ;;  %v860_v40 = vmin.f32 %v859_v38, 16.0 }
 0x344   : > { %v836_v42 = vmul.f32 %v835_v0, %v820_v28  ;;  %v861_v43 = vmul.f32 2.1237322e-06, %v860_v40  ;;  %v872_v44 = vmul.f32 3.8918573e-05, %v860_v40  ;;  %v825_v47 = vmul.f32 %v824_v39, %v820_v28 }
 0x345   : > { %v815_v0 = vmul.f32 0.5, %v1530_v27 }
 0x346   : > { %v837_v46 = vadd.f32 0.112945676, %v836_v42  ;;  %v862_v48 = vadd.f32 0.00028619796, %v861_v43  ;;  %v873_v49 = vadd.f32 0.001143296, %v872_v44 }
 0x347   : > { %v826_v56 = vadd.f32 0.05243302, %v825_v47  ;;  %v816_v47 = vmul.f32 0.5, %v1537_v31 }
 0x348   : > { %v838_v51 = vmul.f32 %v837_v46, %v820_v28  ;;  %v863_v52 = vmul.f32 %v862_v48, %v860_v40  ;;  %v874_v53 = vmul.f32 %v873_v49, %v860_v40  ;;  %v1121_v49 = vld [vmem:[%s1615_s12] ss:$0 sm:$0xff] }
 0x349   : > { %v827_v62 = vmul.f32 %v826_v56, %v820_v28 }
 0x34a   : > { %v839_v55 = vadd.f32 0.4994258, %v838_v51  ;;  %v875_v57 = vadd.f32 0.014752088, %v874_v53  ;;  %v864_v59 = vadd.f32 0.0036580483, %v863_v52 }
 0x34b   : > { %v828_v6 = vadd.f32 0.18741608, %v827_v62 }
 0x34c   : > { %v840_v58 = vmul.f32 %v839_v55, %v820_v28  ;;  %v876_v60 = vmul.f32 %v875_v57, %v860_v40  ;;  %v865_v4 = vmul.f32 %v864_v59, %v860_v40 }
 0x34d   : > { %v829_v12 = vmul.f32 %v828_v6, %v820_v28 }
 0x34e   : > { %v841_v61 = vadd.f32 1.0, %v840_v58  ;;  %v877_v2 = vadd.f32 0.112945676, %v876_v60  ;;  %v866_v9 = vadd.f32 0.05243302, %v865_v4 }
 0x34f   : > { %v830_v19 = vadd.f32 1.1283791, %v829_v12 }
 0x350   : > { %1136 = vrcp.f32 %v841_v61  ;;  %v878_v5 = vmul.f32 %v877_v2, %v860_v40  ;;  %v867_v16 = vmul.f32 %v866_v9, %v860_v40  ;;  %v853_v18 = vand.u32 2147483648, %v841_v61 }
 0x351   : > { %v851_v21 = vand.u32 2147483647, %v841_v61  ;;  %vm847_vm9 = vweird.f32 %v841_v61  ;;  %v831_v25 = vmul.f32 %v830_v19, %v1533_v10 }
 0x352   : > { %v879_v8 = vadd.f32 0.4994258, %v878_v5  ;;  %v868_v1 = vadd.f32 0.18741608, %v867_v16  ;;  %v854_v23 = vor.u32 1.1754944e-38, %v853_v18 }
 0x353   : > { %vm852_vm11 = vcmp.eq.f32.partialorder %v851_v21, 8.507059e+37 }
 0x354   : > { %v880_v14 = vmul.f32 %v879_v8, %v860_v40  ;;  %v869_v28 = vmul.f32 %v868_v1, %v860_v40 }
 0x356   : > { %v1137_v11 = vpop.eup %1136  ;;  %v881_v15 = vadd.f32 1.0, %v880_v14  ;;  %v870_v36 = vadd.f32 1.1283791, %v869_v28 }
 0x357   : > { %v843_v13 = vmul.f32 %v1137_v11, %v841_v61  ;;  %vm848_vm8 = vweird.f32 %v1137_v11 }
 0x358   : > { %1138 = vrcp.f32 %v881_v15  ;;  %vm849_vm10 = vmor %vm847_vm9, %vm848_vm8  ;;  %v893_v32 = vand.u32 2147483648, %v881_v15  ;;  %v891_v38 = vand.u32 2147483647, %v881_v15  ;;  %vm887_vm13 = vweird.f32 %v881_v15 }
 0x359   : > { %v844_v17 = vsub.f32 1.0, %v843_v13  ;;  %v871_v40 = vmul.f32 %v870_v36, %v1540_v35 }
 0x35a   : > { %v894_v10 = vor.u32 1.1754944e-38, %v893_v32  ;;  %vm892_vm15 = vcmp.eq.f32.partialorder %v891_v38, 8.507059e+37 }
 0x35b   : > { %v845_v20 = vmul.f32 %v1137_v11, %v844_v17 }
 0x35d   : > { %v846_v22 = vadd.f32 %v1137_v11, %v845_v20 }
 0x35e   : > { %v1139_v24 = vpop.eup %1138 }
 0x35f   : > { %v850_v26 = vsel %vm849_vm10, %v1137_v11, %v846_v22  ;;  %v883_v29 = vmul.f32 %v1139_v24, %v881_v15  ;;  %vm888_vm12 = vweird.f32 %v1139_v24 }
 0x360   : > { %v855_v7 = vsel %vm852_vm11, %v854_v23, %v850_v26  ;;  %vm889_vm14 = vmor %vm887_vm13, %vm888_vm12 }
 0x361   : > { %v856_v63 = vmul.f32 %v855_v7, %v831_v25  ;;  %v884_v30 = vsub.f32 1.0, %v883_v29 }
 0x363   : > { %v1050_v33 = vclamps-f32 %v856_v63, 1.0  ;;  %v885_v3 = vmul.f32 %v1139_v24, %v884_v30 }
 0x365   : > { %v899_v39 = vadd.f32 1.0, %v1050_v33  ;;  %v886_v41 = vadd.f32 %v1139_v24, %v885_v3 }
 0x367   : > { %v901_v42 = vmul.f32 %v899_v39, %v815_v0  ;;  %v890_v43 = vsel %vm889_vm14, %v1139_v24, %v886_v41 }
 0x368   : > { %v895_v44 = vsel %vm892_vm15, %v894_v10, %v890_v43 }
 0x369   : > { %1052 = vmatmul.msk.f32.vlgmr.msra.gmra.mxu3 %vm467_vm0, %v901_v42  ;;  %v896_v45 = vmul.f32 %v895_v44, %v871_v40 }
 0x36b   : > { %v1051_v46 = vclamps-f32 %v896_v45, 1.0 }
 0x36d   : > { %v900_v27 = vadd.f32 1.0, %v1051_v46 }
 0x36f   : > { %v902_v48 = vmul.f32 %v900_v27, %v816_v47 }
 0x371   : > { %1053 = vmatmul.msk.f32.gmra.mxu3 %vm467_vm0, %v902_v48 }
 0x3ec   : > { %v934_v35 = vpop.f32.mrf.mxu3 }
 0x3ed   : > { %v935_v50 = vadd.f32 %v1121_v49, %v934_v35 }
 0x3ef   : > { %v940_v51 = vadd.f32 %v935_v50, %v1486_v34 }
 0x3f1   : > { %942 = vst.msk [vmem:[%s460_s18] sm:$0xff] %vm467_vm0, %v940_v51 }
 0x3f4   : > { %v937_v31 = vpop.f32.mrf.mxu3 }
 0x3f5   : > { %v938_v52 = vadd.f32 %v1121_v49, %v937_v31 }
 0x3f7   : > { %v941_v53 = vadd.f32 %v938_v52, %v1494_v37 }
 0x3f9   : > { %943 = vst.msk [vmem:[%s460_s18 + $0x8] sm:$0xff] %vm467_vm0, %v941_v53 }
 0x3fa   : > { %1197 = shalt.err (!%p1194_p4)
}
 0x3fb   : > { %s1242_s16 = smov 128   ;;  %s1243_s18 = smov 8  }
 0x3fc   : > { %1063 = dma.vmem_to_hbm [thread:$0]  (%p1363_p10), %s958_s25, 256, %s960_s13, %s945_s29, %s1242_s16, %s1242_s16, %s1243_s18  }
 0x3fd PF: > { %s1639_s22 = sld [smem:[#allocation9_spill]]  ;;  %p1074_p5 = scmp.ge.s32.totalorder %s1236_s28, 2 }
 0x3ff   : > { %p1070_p7 = pnand %p1074_p5, %p1367_p11 }
 0x401   : > { %p1071_p8 = pneg %p1070_p7 }
 0x403   : > { %s974_s14 = sand.u32 1, %s1639_s22  }
 0x404   : > { %s975_s19 = scalar_lea.sflag [#allocation5], %s974_s14 }
 0x405   : > { %1219 = dma.done.wait (%p1071_p8), %s975_s19, 256  }
 0x406   : > { %1221 = vsyncadd (%p1071_p8), %s975_s19, 4294967040  ;;  %s1641_s28 = sld [smem:[#allocation11_spill]]  ;;  %s1644_s25 = smov %s1228_s26 }
 0x407   : > { %s1642_s27 = sld [smem:[#allocation10_spill]] }
 0x408   : > { %s1643_s20 = sld [smem:[#allocation12_spill]] }
 0x40c   : > { %p26_p9 = scmp.ge.s32.totalorder %s1641_s28, 10  }
 0x40d   : > { %s1645_s26 = smov %s1642_s27 }
 0x40e   : > { %s1646_s27 = smov %s1643_s20  ;;  %28 = sbr.rel (!%p26_p9) target bundleno = 7 (0x7), region = 117 }
 0x413   :  { %981 = vsyncpa [#allocation4], 1 }
 0x414   :  { %983 = vsyncpa [#allocation4 + $0x1], 1 }
 0x415   :  { %984 = vsyncpa [#allocation5], 1 }
 0x416   :  { %986 = vsyncpa [#allocation5 + $0x1], 1 }

</bundles_post_ra>
